<compile_context>
chip_gen: v5e
topology: v5e:2x2
jax: 0.10.0
libtpu: 0.0.40
codegen_flags: <defaults>
</compile_context>

<pallas_src>
import jax
import jax.numpy as jnp
from jax.experimental import pallas as pl
from jax.experimental.pallas import tpu as pltpu


def _round_up(x, m):
    return ((x + m - 1) // m) * m


def _inner_product_decoder_kernel(a_ref, b_ref, o_ref):
    # a_ref: (tm, D) row tile of inp (native dtype, fed straight to the MXU)
    # b_ref: (tn, D) col tile of inp (same array, different row window)
    # o_ref: (tm, tn) output tile = sigmoid(a @ b.T), stored in o_ref.dtype
    logits = jax.lax.dot_general(
        a_ref[...], b_ref[...],
        dimension_numbers=(((1,), (1,)), ((), ())),  # a @ b.T
        preferred_element_type=jnp.float32,          # f32 accumulation on MXU
    )
    # sigmoid(x) == 0.5 * (tanh(0.5 * x) + 1): single EUP op, VALU does the rest.
    o_ref[...] = (0.5 * (jnp.tanh(0.5 * logits) + 1.0)).astype(o_ref.dtype)


def inner_product_decoder(inp, *, dropout=0.0, tile=None):
    """sigmoid(inp @ inp.T) with dropout p=0.0 (no-op, eval semantics)."""
    # TODO(synk): training-mode dropout (stateful PRNG masking) not implemented;
    # with dropout=0.0 (the module default) this is exact.
    assert dropout == 0.0
    N, D = inp.shape
    out_dtype = inp.dtype

    # Tile selection: lane dim (tn) multiple of 128, sublane (tm) multiple of
    # 8 (f32) / 16 (bf16). 512x512 output tiles hit ~85% of the HBM roofline
    # and stay far below the 64 MiB VMEM budget on v7x. 128 already satisfies
    # both sublane granularities, so use a single square tile size.
    if tile is None:
        tile = min(512, _round_up(N, 128))
    tile = _round_up(tile, 128)
    tm = tn = tile

    # Pad N up to a tile multiple so the grid is exact (padded rows produce
    # garbage tiles that are sliced away below; D is kept whole so the
    # contraction is never contaminated).
    n_pad = _round_up(N, tile)
    if n_pad != N:
        inp_p = jnp.pad(inp, ((0, n_pad - N), (0, 0)))
    else:
        inp_p = inp

    grid = (n_pad // tm, n_pad // tn)

    # Scoped-VMEM budget: double-buffered inputs + double-buffered output tile,
    # with headroom for compiler internal scratch. Stays well under 64 MiB (v7x).
    in_bytes = jnp.dtype(inp.dtype).itemsize
    out_bytes = jnp.dtype(out_dtype).itemsize
    vmem_bytes = 2 * (tm * D + tn * D) * in_bytes + 2 * tm * tn * out_bytes
    vmem_limit = int(min(64 << 20, max(2 * vmem_bytes + (4 << 20), 16 << 20)))

    # TODO(synk): for very wide embeddings (D > ~2K) add a K grid axis with an
    # f32 VMEM accumulator + pl.when init/finalize; D is kept whole here since
    # graph-embedding hidden sizes are small.
    out_p = pl.pallas_call(
        _inner_product_decoder_kernel,
        out_shape=jax.ShapeDtypeStruct((n_pad, n_pad), out_dtype),
        grid_spec=pltpu.PrefetchScalarGridSpec(
            num_scalar_prefetch=0,
            grid=grid,
            in_specs=[
                pl.BlockSpec((tm, D), lambda i, j: (i, 0)),  # row tile
                pl.BlockSpec((tn, D), lambda i, j: (j, 0)),  # col tile (same array)
            ],
            out_specs=pl.BlockSpec((tm, tn), lambda i, j: (i, j)),
        ),
        compiler_params=pltpu.CompilerParams(
            dimension_semantics=("parallel", "parallel"),  # megacore sharding on v7x
            vmem_limit_bytes=vmem_limit,
        ),
    )(inp_p, inp_p)

    if n_pad != N:
        out_p = out_p[:N, :N]
    return out_p


if __name__ == "__main__":
    key = jax.random.PRNGKey(0)
    N, D = 8, 32  # seq=8 nodes, hidden=32 features
    inp = jax.random.normal(key, (N, D), dtype=jnp.float32)

    out = inner_product_decoder(inp)
    out = jax.block_until_ready(out)

    ref = jax.nn.sigmoid(inp @ inp.T)
    assert out.shape == (N, N)
    assert out.dtype == inp.dtype
    assert jnp.allclose(out, ref, atol=2e-5, rtol=2e-5)

    print("KERNEL_OK")
</pallas_src>

<mosaic_0001>
module attributes {stable_mosaic.version = 11 : i64} {
  func.func @_inner_product_decoder_kernel(%arg0: i32, %arg1: i32, %arg2: memref<128x32xf32, #tpu.memory_space<vmem>>, %arg3: memref<128x32xf32, #tpu.memory_space<vmem>>, %arg4: memref<128x128xf32, #tpu.memory_space<vmem>>) attributes {dimension_semantics = [#tpu.dimension_semantics<parallel>, #tpu.dimension_semantics<parallel>], iteration_bounds = array<i64: 1, 1>, scalar_prefetch = 0 : i64, scratch_operands = 0 : i64, tpu.core_type = #tpu.core_type<tc>, window_params = [{transform_indices = @transform_0, window_bounds = array<i64: 128, 32>}, {transform_indices = @transform_1, window_bounds = array<i64: 128, 32>}, {transform_indices = @transform_2, window_bounds = array<i64: 128, 128>}]} {
    %c0 = arith.constant 0 : index
    %c0_0 = arith.constant 0 : index
    %0 = vector.load %arg2[%c0, %c0_0] : memref<128x32xf32, #tpu.memory_space<vmem>>, vector<128x32xf32>
    %c0_1 = arith.constant 0 : index
    %c0_2 = arith.constant 0 : index
    %1 = vector.load %arg3[%c0_1, %c0_2] : memref<128x32xf32, #tpu.memory_space<vmem>>, vector<128x32xf32>
    %cst = arith.constant dense<0.000000e+00> : vector<128x128xf32>
    %2 = tpu.matmul %0, %1, %cst {dimension_numbers = #tpu.dot_dimension_numbers<[1], [1], [0], [0], [0, 0, 1, 0], [], []>} : vector<128x32xf32>, vector<128x32xf32>, vector<128x128xf32> -> vector<128x128xf32>
    %cst_3 = arith.constant 5.000000e-01 : f32
    %3 = vector.broadcast %cst_3 : f32 to vector<128x128xf32>
    %4 = arith.mulf %3, %2 : vector<128x128xf32>
    %5 = math.tanh %4 : vector<128x128xf32>
    %cst_4 = arith.constant 1.000000e+00 : f32
    %6 = vector.broadcast %cst_4 : f32 to vector<128x128xf32>
    %7 = arith.addf %5, %6 : vector<128x128xf32>
    %cst_5 = arith.constant 5.000000e-01 : f32
    %8 = vector.broadcast %cst_5 : f32 to vector<128x128xf32>
    %9 = arith.mulf %8, %7 : vector<128x128xf32>
    %c0_6 = arith.constant 0 : index
    %c0_7 = arith.constant 0 : index
    %10 = vector.load %arg4[%c0_6, %c0_7] : memref<128x128xf32, #tpu.memory_space<vmem>>, vector<128x128xf32>
    tpu.vector_store %arg4[%c0_6, %c0_7], %9 {strides = array<i32>} : memref<128x128xf32, #tpu.memory_space<vmem>>, vector<128x128xf32>,
    return
  }
  func.func @transform_0(%arg0: i32, %arg1: i32) -> (i32, i32) {
    %c0_i32 = arith.constant 0 : i32
    %c0_i32_0 = arith.constant 0 : i32
    return %arg0, %c0_i32 : i32, i32
  }
  func.func @transform_1(%arg0: i32, %arg1: i32) -> (i32, i32) {
    %c0_i32 = arith.constant 0 : i32
    %c0_i32_0 = arith.constant 0 : i32
    return %arg1, %c0_i32 : i32, i32
  }
  func.func @transform_2(%arg0: i32, %arg1: i32) -> (i32, i32) {
    %c0_i32 = arith.constant 0 : i32
    return %arg0, %arg1 : i32, i32
  }
}

</mosaic_0001>

<bundles_post_ra>
// kernel: tpu_custom_call.1
= control target key start
LH: loop header
LB: loop body
LE: loop exit
PB: predicated region body
PF: predicated region fallthrough
CT: control target
= control target key end

     0   :  { %vm44_vm0 = vcmask 261120   ;;  %s642_s0 = inlined_call_operand.vmem [shape: f32[128,32], index: 0, kind: input, shape index: {}]   ;;  %s643_s1 = inlined_call_operand.vmem [shape: f32[128,32], index: 1, kind: input, shape index: {}]   ;;  %s644_s2 = inlined_call_operand.hbm [shape: f32[128,128], index: 2, kind: output, shape index: {}]  }
   0x1   :  { %v43_v0 = vld [vmem:[%s643_s1 + $0x78] sm:$0xff]  ;;  %v42_v1 = vld [vmem:[%s643_s1 + $0x70] sm:$0xff] }
   0x2   :  { %337 = vmatpush.xpose.msk.msra.mxu2 %vm44_vm0, %v43_v0  ;;  %338 = vmatpush.xpose.msk.msra.mxu3 %vm44_vm0, %v43_v0 }
   0x3   :  { %304 = vmatpush.xpose.msk.msra.mxu0 %vm44_vm0, %v43_v0  ;;  %336 = vmatpush.xpose.msk.msra.mxu1 %vm44_vm0, %v43_v0 }
   0x4   :  { %7 = vsyncpa [#allocation3], 0  ;;  %v41_v2 = vld [vmem:[%s643_s1 + $0x68] sm:$0xff]  ;;  %v40_v3 = vld [vmem:[%s643_s1 + $0x60] sm:$0xff]  ;;  %s292_s18 = sshll.u32 %s644_s2, 4  ;;  %s446_s19 = smov 128   ;;  %s293_s18 = int_to_ptr.hbm [resolvable:$true] %s292_s18 }
   0x5   :  { %v39_v4 = vld [vmem:[%s643_s1 + $0x58] sm:$0xff]  ;;  %v38_v5 = vld [vmem:[%s643_s1 + $0x50] sm:$0xff]  ;;  %v37_v6 = vld [vmem:[%s643_s1 + $0x48] sm:$0xff]  ;;  %s447_s20 = smov 8  }
   0x6   :  { %340 = vmatpush.xpose.msk.msra.mxu2 %vm44_vm0, %v42_v1  ;;  %341 = vmatpush.xpose.msk.msra.mxu3 %vm44_vm0, %v42_v1  ;;  %v36_v7 = vld [vmem:[%s643_s1 + $0x40] sm:$0xff]  ;;  %v35_v8 = vld [vmem:[%s643_s1 + $0x38] sm:$0xff]  ;;  %v34_v9 = vld [vmem:[%s643_s1 + $0x30] sm:$0xff] }
   0x7   :  { %305 = vmatpush.xpose.msk.msra.mxu0 %vm44_vm0, %v42_v1  ;;  %339 = vmatpush.xpose.msk.msra.mxu1 %vm44_vm0, %v42_v1  ;;  %v33_v10 = vld [vmem:[%s643_s1 + $0x28] sm:$0xff]  ;;  %v32_v11 = vld [vmem:[%s643_s1 + $0x20] sm:$0xff]  ;;  %v31_v12 = vld [vmem:[%s643_s1 + $0x18] sm:$0xff] }
   0x8   :  { %v30_v13 = vld [vmem:[%s643_s1 + $0x10] sm:$0xff]  ;;  %v29_v14 = vld [vmem:[%s643_s1 + $0x8] sm:$0xff]  ;;  %v28_v15 = vld [vmem:[%s643_s1] sm:$0xff] }
   0x9   :  { %v20_v16 = vld [vmem:[%s642_s0 + $0x40] sm:$0xff]  ;;  %v21_v20 = vld [vmem:[%s642_s0 + $0x48] sm:$0xff]  ;;  %v22_v24 = vld [vmem:[%s642_s0 + $0x50] sm:$0xff] }
   0xa   :  { %343 = vmatpush.xpose.msk.msra.mxu2 %vm44_vm0, %v41_v2  ;;  %344 = vmatpush.xpose.msk.msra.mxu3 %vm44_vm0, %v41_v2  ;;  %v24_v17 = vld [vmem:[%s642_s0 + $0x60] sm:$0xff]  ;;  %v25_v21 = vld [vmem:[%s642_s0 + $0x68] sm:$0xff]  ;;  %v26_v25 = vld [vmem:[%s642_s0 + $0x70] sm:$0xff] }
   0xb   :  { %306 = vmatpush.xpose.msk.msra.mxu0 %vm44_vm0, %v41_v2  ;;  %342 = vmatpush.xpose.msk.msra.mxu1 %vm44_vm0, %v41_v2  ;;  %v12_v18 = vld [vmem:[%s642_s0] sm:$0xff]  ;;  %v13_v22 = vld [vmem:[%s642_s0 + $0x8] sm:$0xff]  ;;  %v14_v26 = vld [vmem:[%s642_s0 + $0x10] sm:$0xff] }
   0xc   :  { %v16_v19 = vld [vmem:[%s642_s0 + $0x20] sm:$0xff]  ;;  %v17_v23 = vld [vmem:[%s642_s0 + $0x28] sm:$0xff]  ;;  %v18_v27 = vld [vmem:[%s642_s0 + $0x30] sm:$0xff] }
   0xd   :  { %v23_v28 = vld [vmem:[%s642_s0 + $0x58] sm:$0xff] }
   0xe   :  { %346 = vmatpush.xpose.msk.msra.mxu2 %vm44_vm0, %v40_v3  ;;  %347 = vmatpush.xpose.msk.msra.mxu3 %vm44_vm0, %v40_v3  ;;  %v27_v29 = vld [vmem:[%s642_s0 + $0x78] sm:$0xff] }
   0xf   :  { %307 = vmatpush.xpose.msk.msra.mxu0 %vm44_vm0, %v40_v3  ;;  %345 = vmatpush.xpose.msk.msra.mxu1 %vm44_vm0, %v40_v3  ;;  %v15_v30 = vld [vmem:[%s642_s0 + $0x18] sm:$0xff] }
  0x10   :  { %v19_v31 = vld [vmem:[%s642_s0 + $0x38] sm:$0xff]  ;;  %s445_s0 = smov [#allocation2]  }
  0x11   :  { %s290_s16 = sshll.u32 %s445_s0, 4  ;;  %s291_s16 = int_to_ptr.vmem [resolvable:$true] %s290_s16 }
  0x12   :  { %349 = vmatpush.xpose.msk.msra.mxu2 %vm44_vm0, %v39_v4  ;;  %350 = vmatpush.xpose.msk.msra.mxu3 %vm44_vm0, %v39_v4 }
  0x13   :  { %308 = vmatpush.xpose.msk.msra.mxu0 %vm44_vm0, %v39_v4  ;;  %348 = vmatpush.xpose.msk.msra.mxu1 %vm44_vm0, %v39_v4 }
  0x16   :  { %352 = vmatpush.xpose.msk.msra.mxu2 %vm44_vm0, %v38_v5  ;;  %353 = vmatpush.xpose.msk.msra.mxu3 %vm44_vm0, %v38_v5 }
  0x17   :  { %309 = vmatpush.xpose.msk.msra.mxu0 %vm44_vm0, %v38_v5  ;;  %351 = vmatpush.xpose.msk.msra.mxu1 %vm44_vm0, %v38_v5 }
  0x1a   :  { %355 = vmatpush.xpose.msk.msra.mxu2 %vm44_vm0, %v37_v6  ;;  %356 = vmatpush.xpose.msk.msra.mxu3 %vm44_vm0, %v37_v6 }
  0x1b   :  { %310 = vmatpush.xpose.msk.msra.mxu0 %vm44_vm0, %v37_v6  ;;  %354 = vmatpush.xpose.msk.msra.mxu1 %vm44_vm0, %v37_v6 }
  0x1e   :  { %358 = vmatpush.xpose.msk.msra.mxu2 %vm44_vm0, %v36_v7  ;;  %359 = vmatpush.xpose.msk.msra.mxu3 %vm44_vm0, %v36_v7 }
  0x1f   :  { %311 = vmatpush.xpose.msk.msra.mxu0 %vm44_vm0, %v36_v7  ;;  %357 = vmatpush.xpose.msk.msra.mxu1 %vm44_vm0, %v36_v7 }
  0x22   :  { %361 = vmatpush.xpose.msk.msra.mxu2 %vm44_vm0, %v35_v8  ;;  %362 = vmatpush.xpose.msk.msra.mxu3 %vm44_vm0, %v35_v8 }
  0x23   :  { %312 = vmatpush.xpose.msk.msra.mxu0 %vm44_vm0, %v35_v8  ;;  %360 = vmatpush.xpose.msk.msra.mxu1 %vm44_vm0, %v35_v8 }
  0x26   :  { %364 = vmatpush.xpose.msk.msra.mxu2 %vm44_vm0, %v34_v9  ;;  %365 = vmatpush.xpose.msk.msra.mxu3 %vm44_vm0, %v34_v9 }
  0x27   :  { %313 = vmatpush.xpose.msk.msra.mxu0 %vm44_vm0, %v34_v9  ;;  %363 = vmatpush.xpose.msk.msra.mxu1 %vm44_vm0, %v34_v9 }
  0x2a   :  { %367 = vmatpush.xpose.msk.msra.mxu2 %vm44_vm0, %v33_v10  ;;  %368 = vmatpush.xpose.msk.msra.mxu3 %vm44_vm0, %v33_v10 }
  0x2b   :  { %314 = vmatpush.xpose.msk.msra.mxu0 %vm44_vm0, %v33_v10  ;;  %366 = vmatpush.xpose.msk.msra.mxu1 %vm44_vm0, %v33_v10 }
  0x2e   :  { %370 = vmatpush.xpose.msk.msra.mxu2 %vm44_vm0, %v32_v11  ;;  %371 = vmatpush.xpose.msk.msra.mxu3 %vm44_vm0, %v32_v11 }
  0x2f   :  { %315 = vmatpush.xpose.msk.msra.mxu0 %vm44_vm0, %v32_v11  ;;  %369 = vmatpush.xpose.msk.msra.mxu1 %vm44_vm0, %v32_v11 }
  0x32   :  { %373 = vmatpush.xpose.msk.msra.mxu2 %vm44_vm0, %v31_v12  ;;  %374 = vmatpush.xpose.msk.msra.mxu3 %vm44_vm0, %v31_v12 }
  0x33   :  { %316 = vmatpush.xpose.msk.msra.mxu0 %vm44_vm0, %v31_v12  ;;  %372 = vmatpush.xpose.msk.msra.mxu1 %vm44_vm0, %v31_v12 }
  0x36   :  { %376 = vmatpush.xpose.msk.msra.mxu2 %vm44_vm0, %v30_v13  ;;  %377 = vmatpush.xpose.msk.msra.mxu3 %vm44_vm0, %v30_v13 }
  0x37   :  { %317 = vmatpush.xpose.msk.msra.mxu0 %vm44_vm0, %v30_v13  ;;  %375 = vmatpush.xpose.msk.msra.mxu1 %vm44_vm0, %v30_v13 }
  0x3a   :  { %379 = vmatpush.xpose.msk.msra.mxu2 %vm44_vm0, %v29_v14  ;;  %380 = vmatpush.xpose.msk.msra.mxu3 %vm44_vm0, %v29_v14 }
  0x3b   :  { %318 = vmatpush.xpose.msk.msra.mxu0 %vm44_vm0, %v29_v14  ;;  %378 = vmatpush.xpose.msk.msra.mxu1 %vm44_vm0, %v29_v14 }
  0x3e   :  { %382 = vmatpush.xpose.msk.msra.mxu2 %vm44_vm0, %v28_v15  ;;  %383 = vmatpush.xpose.msk.msra.mxu3 %vm44_vm0, %v28_v15 }
  0x3f   :  { %319 = vmatpush.xpose.msk.msra.mxu0 %vm44_vm0, %v28_v15  ;;  %381 = vmatpush.xpose.msk.msra.mxu1 %vm44_vm0, %v28_v15 }
  0x41   :  { %328 = vmatmul.msk.f32.vlgmr.msra.gmra.mxu2 %vm44_vm0, %v20_v16  ;;  %332 = vmatmul.msk.f32.vlgmr.msra.gmra.mxu3 %vm44_vm0, %v24_v17 }
  0x42   :  { %320 = vmatmul.msk.f32.vlgmr.msra.gmra.mxu0 %vm44_vm0, %v12_v18  ;;  %324 = vmatmul.msk.f32.vlgmr.msra.gmra.mxu1 %vm44_vm0, %v16_v19 }
  0x49   :  { %329 = vmatmul.msk.f32.gmra.mxu2 %vm44_vm0, %v21_v20  ;;  %333 = vmatmul.msk.f32.gmra.mxu3 %vm44_vm0, %v25_v21 }
  0x4a   :  { %321 = vmatmul.msk.f32.gmra.mxu0 %vm44_vm0, %v13_v22  ;;  %325 = vmatmul.msk.f32.gmra.mxu1 %vm44_vm0, %v17_v23 }
  0x51   :  { %330 = vmatmul.msk.f32.gmra.mxu2 %vm44_vm0, %v22_v24  ;;  %334 = vmatmul.msk.f32.gmra.mxu3 %vm44_vm0, %v26_v25 }
  0x52   :  { %322 = vmatmul.msk.f32.gmra.mxu0 %vm44_vm0, %v14_v26  ;;  %326 = vmatmul.msk.f32.gmra.mxu1 %vm44_vm0, %v18_v27 }
  0x59   :  { %331 = vmatmul.msk.f32.gmra.mxu2 %vm44_vm0, %v23_v28  ;;  %335 = vmatmul.msk.f32.gmra.mxu3 %vm44_vm0, %v27_v29 }
  0x5a   :  { %323 = vmatmul.msk.f32.gmra.mxu0 %vm44_vm0, %v15_v30  ;;  %327 = vmatmul.msk.f32.gmra.mxu1 %vm44_vm0, %v19_v31 }
  0xbf   :  { %v158_v32 = vpop.f32.mrf.mxu0  ;;  %v170_v33 = vpop.f32.mrf.mxu1 }
  0xc0   :  { %v206_v34 = vmul.f32 0.5, %v158_v32  ;;  %v210_v35 = vmul.f32 0.5, %v170_v33 }
  0xc2   :  { %387 = vtanh.f32 %v206_v34 }
  0xc3   :  { %389 = vtanh.f32 %v210_v35 }
  0xc4   :  { %v182_v36 = vpop.f32.mrf.mxu2  ;;  %v194_v37 = vpop.f32.mrf.mxu3 }
  0xc5   :  { %v214_v38 = vmul.f32 0.5, %v182_v36  ;;  %v218_v39 = vmul.f32 0.5, %v194_v37 }
  0xc7   :  { %391 = vtanh.f32 %v214_v38  ;;  %v161_v40 = vpop.f32.mrf.mxu0  ;;  %v173_v41 = vpop.f32.mrf.mxu1 }
  0xc8   :  { %v388_v42 = vpop.eup %387  ;;  %393 = vtanh.f32 %v218_v39  ;;  %v207_v43 = vmul.f32 0.5, %v161_v40  ;;  %v211_v44 = vmul.f32 0.5, %v173_v41 }
  0xc9   :  { %v390_v45 = vpop.eup %389  ;;  %v238_v46 = vadd.f32 1.0, %v388_v42 }
  0xca   :  { %v242_v47 = vadd.f32 1.0, %v390_v45  ;;  %395 = vtanh.f32 %v207_v43 }
  0xcb   :  { %v254_v48 = vmul.f32 0.5, %v238_v46  ;;  %397 = vtanh.f32 %v211_v44 }
  0xcc   :  { %v258_v49 = vmul.f32 0.5, %v242_v47  ;;  %v185_v50 = vpop.f32.mrf.mxu2  ;;  %v197_v51 = vpop.f32.mrf.mxu3 }
  0xcd   :  { %v392_v52 = vpop.eup %391  ;;  %270 = vst [vmem:[#allocation2] sm:$0xff] %v254_v48  ;;  %v215_v53 = vmul.f32 0.5, %v185_v50  ;;  %v219_v54 = vmul.f32 0.5, %v197_v51 }
  0xce   :  { %v394_v55 = vpop.eup %393  ;;  %274 = vst [vmem:[#allocation2 + $0x20] sm:$0xff] %v258_v49  ;;  %v246_v56 = vadd.f32 1.0, %v392_v52 }
  0xcf   :  { %v250_v57 = vadd.f32 1.0, %v394_v55  ;;  %399 = vtanh.f32 %v215_v53  ;;  %v164_v58 = vpop.f32.mrf.mxu0  ;;  %v176_v59 = vpop.f32.mrf.mxu1 }
  0xd0   :  { %v396_v60 = vpop.eup %395  ;;  %v262_v61 = vmul.f32 0.5, %v246_v56  ;;  %401 = vtanh.f32 %v219_v54  ;;  %v208_v62 = vmul.f32 0.5, %v164_v58  ;;  %v212_v63 = vmul.f32 0.5, %v176_v59 }
  0xd1   :  { %v398_v0 = vpop.eup %397  ;;  %v266_v1 = vmul.f32 0.5, %v250_v57  ;;  %v239_v2 = vadd.f32 1.0, %v396_v60 }
  0xd2   :  { %278 = vst [vmem:[#allocation2 + $0x40] sm:$0xff] %v262_v61  ;;  %v243_v3 = vadd.f32 1.0, %v398_v0  ;;  %403 = vtanh.f32 %v208_v62 }
  0xd3   :  { %282 = vst [vmem:[#allocation2 + $0x60] sm:$0xff] %v266_v1  ;;  %v255_v4 = vmul.f32 0.5, %v239_v2  ;;  %405 = vtanh.f32 %v212_v63 }
  0xd4   :  { %v259_v5 = vmul.f32 0.5, %v243_v3  ;;  %v188_v6 = vpop.f32.mrf.mxu2  ;;  %v200_v7 = vpop.f32.mrf.mxu3 }
  0xd5   :  { %v400_v8 = vpop.eup %399  ;;  %271 = vst [vmem:[#allocation2 + $0x8] sm:$0xff] %v255_v4  ;;  %v216_v9 = vmul.f32 0.5, %v188_v6  ;;  %v220_v10 = vmul.f32 0.5, %v200_v7 }
  0xd6   :  { %v402_v11 = vpop.eup %401  ;;  %275 = vst [vmem:[#allocation2 + $0x28] sm:$0xff] %v259_v5  ;;  %v247_v12 = vadd.f32 1.0, %v400_v8 }
  0xd7   :  { %v251_v13 = vadd.f32 1.0, %v402_v11  ;;  %407 = vtanh.f32 %v216_v9  ;;  %v167_v14 = vpop.f32.mrf.mxu0  ;;  %v179_v15 = vpop.f32.mrf.mxu1 }
  0xd8   :  { %v404_v16 = vpop.eup %403  ;;  %v263_v17 = vmul.f32 0.5, %v247_v12  ;;  %409 = vtanh.f32 %v220_v10  ;;  %v209_v18 = vmul.f32 0.5, %v167_v14  ;;  %v213_v19 = vmul.f32 0.5, %v179_v15 }
  0xd9   :  { %v406_v20 = vpop.eup %405  ;;  %v267_v21 = vmul.f32 0.5, %v251_v13  ;;  %v240_v22 = vadd.f32 1.0, %v404_v16 }
  0xda   :  { %279 = vst [vmem:[#allocation2 + $0x48] sm:$0xff] %v263_v17  ;;  %v244_v23 = vadd.f32 1.0, %v406_v20  ;;  %411 = vtanh.f32 %v209_v18 }
  0xdb   :  { %283 = vst [vmem:[#allocation2 + $0x68] sm:$0xff] %v267_v21  ;;  %v256_v24 = vmul.f32 0.5, %v240_v22  ;;  %413 = vtanh.f32 %v213_v19 }
  0xdc   :  { %v260_v25 = vmul.f32 0.5, %v244_v23  ;;  %v191_v26 = vpop.f32.mrf.mxu2  ;;  %v203_v27 = vpop.f32.mrf.mxu3 }
  0xdd   :  { %v408_v28 = vpop.eup %407  ;;  %272 = vst [vmem:[#allocation2 + $0x10] sm:$0xff] %v256_v24  ;;  %v217_v29 = vmul.f32 0.5, %v191_v26  ;;  %v221_v30 = vmul.f32 0.5, %v203_v27 }
  0xde   :  { %v410_v31 = vpop.eup %409  ;;  %276 = vst [vmem:[#allocation2 + $0x30] sm:$0xff] %v260_v25  ;;  %v248_v32 = vadd.f32 1.0, %v408_v28 }
  0xdf   :  { %v252_v33 = vadd.f32 1.0, %v410_v31  ;;  %415 = vtanh.f32 %v217_v29 }
  0xe0   :  { %v412_v34 = vpop.eup %411  ;;  %v264_v35 = vmul.f32 0.5, %v248_v32  ;;  %417 = vtanh.f32 %v221_v30 }
  0xe1   :  { %v414_v36 = vpop.eup %413  ;;  %v268_v37 = vmul.f32 0.5, %v252_v33  ;;  %v241_v38 = vadd.f32 1.0, %v412_v34 }
  0xe2   :  { %280 = vst [vmem:[#allocation2 + $0x50] sm:$0xff] %v264_v35  ;;  %v245_v39 = vadd.f32 1.0, %v414_v36 }
  0xe3   :  { %284 = vst [vmem:[#allocation2 + $0x70] sm:$0xff] %v268_v37  ;;  %v257_v40 = vmul.f32 0.5, %v241_v38 }
  0xe4   :  { %v261_v41 = vmul.f32 0.5, %v245_v39 }
  0xe5   :  { %v416_v42 = vpop.eup %415  ;;  %273 = vst [vmem:[#allocation2 + $0x18] sm:$0xff] %v257_v40 }
  0xe6   :  { %v418_v43 = vpop.eup %417  ;;  %277 = vst [vmem:[#allocation2 + $0x38] sm:$0xff] %v261_v41  ;;  %v249_v44 = vadd.f32 1.0, %v416_v42 }
  0xe7   :  { %v253_v45 = vadd.f32 1.0, %v418_v43 }
  0xe8   :  { %v265_v46 = vmul.f32 0.5, %v249_v44 }
  0xe9   :  { %v269_v47 = vmul.f32 0.5, %v253_v45 }
  0xea   :  { %281 = vst [vmem:[#allocation2 + $0x58] sm:$0xff] %v265_v46 }
  0xeb   :  { %285 = vst [vmem:[#allocation2 + $0x78] sm:$0xff] %v269_v47 }
  0xec   :  { %298 = dma.vmem_to_hbm [thread:$0]  %s291_s16, 2048, %s293_s18, [#allocation3], %s446_s19, %s446_s19, %s447_s20  }
  0xed   :  { %443 = dma.done.wait [#allocation3], 2048  }
  0xee   :  { %444 = vsyncadd [#allocation3], 4294965248 }
  0xef   :  { %303 = vsyncpa [#allocation3], 1 }

</bundles_post_ra>
